<compile_context>
chip_gen: v5e
topology: v5e:2x2
jax: 0.10.0
libtpu: 0.0.40
codegen_flags: <defaults>
</compile_context>

<pallas_src>
import numpy as np

import jax
import jax.numpy as jnp
from jax.experimental import pallas as pl
from jax.experimental.pallas import tpu as pltpu


def _round_up(x: int, m: int) -> int:
    return ((x + m - 1) // m) * m


# --------------------------------------------------------------------------
# Kernels
# --------------------------------------------------------------------------
def mlp_kernel_fused(x_ref, w1_ref, b1_ref, w2_ref, b2_ref, o_ref):
    """Whole MLP per m-tile (weights fully VMEM-resident).

    x_ref:  [tm, D_in]    w1_ref: [D_in, H_pad]   b1_ref: [1, H_pad] (f32)
    w2_ref: [H_pad, N_pad] b2_ref: [1, N_pad] (f32)   o_ref: [tm, N_pad]
    """
    h = jnp.dot(x_ref[...], w1_ref[...], preferred_element_type=jnp.float32)
    h = jnp.maximum(h + b1_ref[...], 0.0)                       # bias + ReLU (f32)
    out = jnp.dot(h.astype(w2_ref.dtype), w2_ref[...],
                  preferred_element_type=jnp.float32)
    o_ref[...] = (out + b2_ref[...]).astype(o_ref.dtype)


def mlp_kernel_tiled(x_ref, w1_ref, b1_ref, w2_ref, b2_ref, o_ref, acc_ref):
    """One (m-tile, hidden-tile) step of the fused MLP.

    x_ref:  [tm, D_in]          (compute dtype)
    w1_ref: [D_in, th]          (compute dtype, hidden slice)
    b1_ref: [1, th]             (f32, hidden slice)
    w2_ref: [th, N_pad]         (compute dtype, hidden slice)
    b2_ref: [1, N_pad]          (f32)
    o_ref:  [tm, N_pad]         (output dtype)
    acc_ref:[tm, N_pad]         (f32 VMEM accumulator, resident across k)
    """
    k = pl.program_id(1)

    @pl.when(k == 0)
    def _():
        acc_ref[...] = jnp.zeros_like(acc_ref)

    # First matmul on this hidden slice: [tm, D_in] @ [D_in, th] -> f32.
    h = jnp.dot(x_ref[...], w1_ref[...], preferred_element_type=jnp.float32)
    h = jnp.maximum(h + b1_ref[...], 0.0)                       # bias + ReLU (f32)

    # Second matmul, accumulated over hidden slices into f32 scratch.
    acc_ref[...] += jnp.dot(h.astype(w2_ref.dtype), w2_ref[...],
                            preferred_element_type=jnp.float32)

    @pl.when(k == pl.num_programs(1) - 1)
    def _():
        o_ref[...] = (acc_ref[...] + b2_ref[...]).astype(o_ref.dtype)


# --------------------------------------------------------------------------
# Wrapper
# --------------------------------------------------------------------------
def _pad2d(a, shape, dtype):
    """Zero-pad `a` to `shape` (cast to dtype); no-op copy path if aligned."""
    a = a.astype(dtype)
    if a.shape == shape:
        return a
    return jnp.zeros(shape, dtype).at[: a.shape[0], : a.shape[1]].set(a)


def mlp_forward(x, w1, b1, w2, b2, *, block_m=None, block_h=None,
                compute_dtype=None):
    """Fused Linear -> ReLU -> Linear.

    x:  [M, D_in]   w1: [D_in, H]   b1: [H]   w2: [H, D_out]   b2: [D_out]
    Returns [M, D_out] in x.dtype.
    """
    M, D_in = x.shape
    d_in_w, H = w1.shape
    h_w2, D_out = w2.shape
    assert d_in_w == D_in and h_w2 == H and b1.shape == (H,) and b2.shape == (D_out,)

    out_dtype = x.dtype
    if compute_dtype is None:
        compute_dtype = x.dtype
    compute_dtype = jnp.dtype(compute_dtype)
    c_itemsize = compute_dtype.itemsize
    out_itemsize = jnp.dtype(out_dtype).itemsize

    # ---- Tile-size selection (lane=128 / sublane=8 aligned) -----------------
    N_pad = _round_up(D_out, 128)                 # lane-dense output stores
    H_pad128 = _round_up(H, 128)

    if block_m is None:
        cap = 1024 if c_itemsize <= 2 else 512    # bigger tiles for bf16
        block_m = min(cap, _round_up(M, 8))
    block_m = max(8, _round_up(block_m, 8))
    M_pad = _round_up(M, block_m)                 # handles M % block_m != 0

    # Weight-resident VMEM footprint of the fused path (weights live once;
    # x/out tiles are double-buffered by the BlockSpec pipeline).
    fused_vmem = (
        D_in * H_pad128 * c_itemsize              # w1
        + H_pad128 * N_pad * c_itemsize           # w2
        + (H_pad128 + N_pad) * 4                  # biases (f32)
        + 2 * block_m * D_in * c_itemsize         # x tiles (double-buffered)
        + 2 * block_m * N_pad * out_itemsize      # out tiles (double-buffered)
        + block_m * H_pad128 * 4                  # f32 intermediate h
        + block_m * N_pad * 4                     # f32 pre-cast output
    )
    # Conservative threshold: comfortably under v5e's 16 MiB scoped default.
    use_fused = (block_h is None) and (fused_vmem <= 12 * 1024 * 1024)

    if use_fused:
        H_pad = H_pad128
    else:
        if block_h is None:
            block_h = min(512, H_pad128)          # hidden (reduction) tile
        block_h = _round_up(block_h, 128)
        H_pad = _round_up(H, block_h)

    # ---- Pad + cast operands (zeros in padding preserve semantics) ----------
    xp = _pad2d(x, (M_pad, D_in), compute_dtype)
    w1p = _pad2d(w1, (D_in, H_pad), compute_dtype)
    w2p = _pad2d(w2, (H_pad, N_pad), compute_dtype)
    # Biases kept in f32 (added to the f32 accumulations in-kernel).
    b1p = _pad2d(b1.reshape(1, H), (1, H_pad), jnp.float32)
    b2p = _pad2d(b2.reshape(1, D_out), (1, N_pad), jnp.float32)

    cost = pl.CostEstimate(
        flops=2 * M_pad * (D_in * H_pad + H_pad * N_pad),
        transcendentals=0,
        bytes_accessed=(xp.size * c_itemsize + w1p.size * c_itemsize
                        + w2p.size * c_itemsize + b1p.size * 4 + b2p.size * 4
                        + M_pad * N_pad * out_itemsize),
    )

    if use_fused:
        vmem_limit = min(max(2 * fused_vmem, 32 * 1024 * 1024),
                         60 * 1024 * 1024)
        out_padded = pl.pallas_call(
            mlp_kernel_fused,
            out_shape=jax.ShapeDtypeStruct((M_pad, N_pad), out_dtype),
            grid_spec=pltpu.PrefetchScalarGridSpec(
                num_scalar_prefetch=0,
                grid=(M_pad // block_m,),
                in_specs=[
                    pl.BlockSpec((block_m, D_in), lambda i: (i, 0)),   # x
                    pl.BlockSpec((D_in, H_pad), lambda i: (0, 0)),     # w1
                    pl.BlockSpec((1, H_pad), lambda i: (0, 0)),        # b1
                    pl.BlockSpec((H_pad, N_pad), lambda i: (0, 0)),    # w2
                    pl.BlockSpec((1, N_pad), lambda i: (0, 0)),        # b2
                ],
                out_specs=pl.BlockSpec((block_m, N_pad), lambda i: (i, 0)),
            ),
            compiler_params=pltpu.CompilerParams(
                dimension_semantics=("parallel",),
                vmem_limit_bytes=int(vmem_limit),
            ),
            cost_estimate=cost,
        )(xp, w1p, b1p, w2p, b2p)
        return out_padded[:M, :D_out]

    # ---- Tiled (large-hidden) path ------------------------------------------
    grid = (M_pad // block_m, H_pad // block_h)
    vmem_need = (
        2 * block_m * D_in * c_itemsize          # x tile
        + 2 * D_in * block_h * c_itemsize        # w1 tile
        + 2 * block_h * 4                        # b1 tile (f32)
        + 2 * block_h * N_pad * c_itemsize       # w2 tile
        + 2 * N_pad * 4                          # b2 (f32)
        + 2 * block_m * N_pad * out_itemsize     # out tile
        + block_m * N_pad * 4                    # accumulator
        + block_m * block_h * 4                  # f32 intermediate h
    )
    vmem_limit = min(max(2 * vmem_need, 32 * 1024 * 1024), 60 * 1024 * 1024)

    out_padded = pl.pallas_call(
        mlp_kernel_tiled,
        out_shape=jax.ShapeDtypeStruct((M_pad, N_pad), out_dtype),
        grid_spec=pltpu.PrefetchScalarGridSpec(
            num_scalar_prefetch=0,
            grid=grid,
            in_specs=[
                pl.BlockSpec((block_m, D_in), lambda i, k: (i, 0)),   # x
                pl.BlockSpec((D_in, block_h), lambda i, k: (0, k)),   # w1 slice
                pl.BlockSpec((1, block_h), lambda i, k: (0, k)),      # b1 slice
                pl.BlockSpec((block_h, N_pad), lambda i, k: (k, 0)),  # w2 slice
                pl.BlockSpec((1, N_pad), lambda i, k: (0, 0)),        # b2
            ],
            out_specs=pl.BlockSpec((block_m, N_pad), lambda i, k: (i, 0)),
            scratch_shapes=[pltpu.VMEM((block_m, N_pad), jnp.float32)],
        ),
        compiler_params=pltpu.CompilerParams(
            dimension_semantics=("parallel", "arbitrary"),
            vmem_limit_bytes=int(vmem_limit),
        ),
        cost_estimate=cost,
    )(xp, w1p, b1p, w2p, b2p)

    return out_padded[:M, :D_out]


def init_linear_params(key, fan_in, fan_out, dtype=jnp.float32):
    """Deterministic PyTorch-style init: U(-1/sqrt(fan_in), 1/sqrt(fan_in))."""
    k_w, k_b = jax.random.split(key)
    bound = 1.0 / np.sqrt(fan_in)
    # Stored as [fan_in, fan_out] (already transposed relative to PyTorch).
    w = jax.random.uniform(k_w, (fan_in, fan_out), dtype, -bound, bound)
    b = jax.random.uniform(k_b, (fan_out,), dtype, -bound, bound)
    return w, b


if __name__ == "__main__":
    key = jax.random.PRNGKey(0)

    # ---- Test 1: small shapes consistent with Network(in, hidden, out), f32.
    # Exercises the FUSED (weights-resident) path.
    batch, input_dim, hidden_dim, output_dim = 8, 32, 64, 16
    k_x, k_l1, k_l2, k_x2, k_l3, k_l4 = jax.random.split(key, 6)

    x = jax.random.normal(k_x, (batch, input_dim), dtype=jnp.float32)
    w1, b1 = init_linear_params(k_l1, input_dim, hidden_dim)
    w2, b2 = init_linear_params(k_l2, hidden_dim, output_dim)

    out = jax.block_until_ready(mlp_forward(x, w1, b1, w2, b2))
    ref = jnp.maximum(x @ w1 + b1, 0.0) @ w2 + b2
    assert out.shape == (batch, output_dim)
    assert jnp.allclose(out, ref, atol=1e-5, rtol=1e-5)

    # ---- Test 2: ragged shapes + bf16 compute (f32 accumulate), TILED path.
    M2, D2_in, H2, D2_out = 300, 48, 384, 20
    x2 = jax.random.normal(k_x2, (M2, D2_in), dtype=jnp.float32)
    w1b, b1b = init_linear_params(k_l3, D2_in, H2)
    w2b, b2b = init_linear_params(k_l4, H2, D2_out)

    out2 = jax.block_until_ready(
        mlp_forward(x2, w1b, b1b, w2b, b2b,
                    block_m=128, block_h=128, compute_dtype=jnp.bfloat16))
    ref2 = jnp.maximum(x2 @ w1b + b1b, 0.0) @ w2b + b2b
    assert out2.shape == (M2, D2_out)
    assert jnp.allclose(out2, ref2, atol=5e-2, rtol=5e-2)

    print("KERNEL_OK")
</pallas_src>

<mosaic_0001>
module attributes {stable_mosaic.version = 11 : i64} {
  func.func @mlp_kernel_fused(%arg0: i32, %arg1: memref<8x32xf32, #tpu.memory_space<vmem>>, %arg2: memref<32x128xf32, #tpu.memory_space<vmem>>, %arg3: memref<1x128xf32, #tpu.memory_space<vmem>>, %arg4: memref<128x128xf32, #tpu.memory_space<vmem>>, %arg5: memref<1x128xf32, #tpu.memory_space<vmem>>, %arg6: memref<8x128xf32, #tpu.memory_space<vmem>>) attributes {dimension_semantics = [#tpu.dimension_semantics<parallel>], iteration_bounds = array<i64: 1>, scalar_prefetch = 0 : i64, scratch_operands = 0 : i64, tpu.core_type = #tpu.core_type<tc>, window_params = [{transform_indices = @transform_0, window_bounds = array<i64: 8, 32>}, {pipeline_mode = #tpu.pipeline_mode<synchronous>, transform_indices = @transform_1, window_bounds = array<i64: 32, 128>}, {pipeline_mode = #tpu.pipeline_mode<synchronous>, transform_indices = @transform_2, window_bounds = array<i64: 1, 128>}, {pipeline_mode = #tpu.pipeline_mode<synchronous>, transform_indices = @transform_3, window_bounds = array<i64: 128, 128>}, {pipeline_mode = #tpu.pipeline_mode<synchronous>, transform_indices = @transform_4, window_bounds = array<i64: 1, 128>}, {transform_indices = @transform_5, window_bounds = array<i64: 8, 128>}]} {
    %c0 = arith.constant 0 : index
    %c0_0 = arith.constant 0 : index
    %0 = vector.load %arg1[%c0, %c0_0] : memref<8x32xf32, #tpu.memory_space<vmem>>, vector<8x32xf32>
    %c0_1 = arith.constant 0 : index
    %c0_2 = arith.constant 0 : index
    %1 = vector.load %arg2[%c0_1, %c0_2] : memref<32x128xf32, #tpu.memory_space<vmem>>, vector<32x128xf32>
    %cst = arith.constant dense<0.000000e+00> : vector<8x128xf32>
    %2 = tpu.matmul %0, %1, %cst {dimension_numbers = #tpu.dot_dimension_numbers<[1], [0], [0], [1], [0, 0, 1, 1], [], []>} : vector<8x32xf32>, vector<32x128xf32>, vector<8x128xf32> -> vector<8x128xf32>
    %c0_3 = arith.constant 0 : index
    %c0_4 = arith.constant 0 : index
    %3 = vector.load %arg3[%c0_3, %c0_4] : memref<1x128xf32, #tpu.memory_space<vmem>>, vector<1x128xf32>
    %4 = vector.broadcast %3 : vector<1x128xf32> to vector<8x128xf32>
    %5 = arith.addf %2, %4 : vector<8x128xf32>
    %cst_5 = arith.constant 0.000000e+00 : f32
    %6 = vector.broadcast %cst_5 : f32 to vector<8x128xf32>
    %7 = arith.maximumf %5, %6 : vector<8x128xf32>
    %c0_6 = arith.constant 0 : index
    %c0_7 = arith.constant 0 : index
    %8 = vector.load %arg4[%c0_6, %c0_7] : memref<128x128xf32, #tpu.memory_space<vmem>>, vector<128x128xf32>
    %cst_8 = arith.constant dense<0.000000e+00> : vector<8x128xf32>
    %9 = tpu.matmul %7, %8, %cst_8 {dimension_numbers = #tpu.dot_dimension_numbers<[1], [0], [0], [1], [0, 0, 1, 1], [], []>} : vector<8x128xf32>, vector<128x128xf32>, vector<8x128xf32> -> vector<8x128xf32>
    %c0_9 = arith.constant 0 : index
    %c0_10 = arith.constant 0 : index
    %10 = vector.load %arg5[%c0_9, %c0_10] : memref<1x128xf32, #tpu.memory_space<vmem>>, vector<1x128xf32>
    %11 = vector.broadcast %10 : vector<1x128xf32> to vector<8x128xf32>
    %12 = arith.addf %9, %11 : vector<8x128xf32>
    %c0_11 = arith.constant 0 : index
    %c0_12 = arith.constant 0 : index
    %13 = vector.load %arg6[%c0_11, %c0_12] : memref<8x128xf32, #tpu.memory_space<vmem>>, vector<8x128xf32>
    tpu.vector_store %arg6[%c0_11, %c0_12], %12 {strides = array<i32>} : memref<8x128xf32, #tpu.memory_space<vmem>>, vector<8x128xf32>,
    return
  }
  func.func @transform_0(%arg0: i32) -> (i32, i32) {
    %c0_i32 = arith.constant 0 : i32
    %c0_i32_0 = arith.constant 0 : i32
    return %arg0, %c0_i32 : i32, i32
  }
  func.func @transform_1(%arg0: i32) -> (i32, i32) {
    %c0_i32 = arith.constant 0 : i32
    %c0_i32_0 = arith.constant 0 : i32
    %c0_i32_1 = arith.constant 0 : i32
    return %c0_i32, %c0_i32_0 : i32, i32
  }
  func.func @transform_2(%arg0: i32) -> (i32, i32) {
    %c0_i32 = arith.constant 0 : i32
    %c0_i32_0 = arith.constant 0 : i32
    %c0_i32_1 = arith.constant 0 : i32
    return %c0_i32, %c0_i32_0 : i32, i32
  }
  func.func @transform_3(%arg0: i32) -> (i32, i32) {
    %c0_i32 = arith.constant 0 : i32
    %c0_i32_0 = arith.constant 0 : i32
    %c0_i32_1 = arith.constant 0 : i32
    return %c0_i32, %c0_i32_0 : i32, i32
  }
  func.func @transform_4(%arg0: i32) -> (i32, i32) {
    %c0_i32 = arith.constant 0 : i32
    %c0_i32_0 = arith.constant 0 : i32
    %c0_i32_1 = arith.constant 0 : i32
    return %c0_i32, %c0_i32_0 : i32, i32
  }
  func.func @transform_5(%arg0: i32) -> (i32, i32) {
    %c0_i32 = arith.constant 0 : i32
    %c0_i32_0 = arith.constant 0 : i32
    return %arg0, %c0_i32 : i32, i32
  }
}

</mosaic_0001>

<bundles_post_ra>
// kernel: tpu_custom_call.1
= control target key start
LH: loop header
LB: loop body
LE: loop exit
PB: predicated region body
PF: predicated region fallthrough
CT: control target
= control target key end

     0   :  { %10 = vsyncpa [#allocation3], 0  ;;  %s324_s0 = inlined_call_operand.hbm [shape: f32[8,32], index: 0, kind: input, shape index: {}]   ;;  %s325_s1 = inlined_call_operand.hbm [shape: f32[32,128], index: 1, kind: input, shape index: {}]   ;;  %s326_s2 = inlined_call_operand.vmem [shape: f32[1,128], index: 2, kind: input, shape index: {}]   ;;  %s327_s3 = inlined_call_operand.hbm [shape: f32[128,128], index: 3, kind: input, shape index: {}]   ;;  %s328_s4 = inlined_call_operand.vmem [shape: f32[1,128], index: 4, kind: input, shape index: {}]   ;;  %s329_s5 = inlined_call_operand.hbm [shape: f32[8,128], index: 5, kind: output, shape index: {}]  }
   0x1   :  { %11 = vsyncpa [#allocation6], 0  ;;  %s28_s20 = sshll.u32 %s325_s1, 4  ;;  %s29_s20 = int_to_ptr.hbm [resolvable:$true] %s28_s20 }
   0x2   :  { %12 = vsyncpa [#allocation4], 0  ;;  %s270_s21 = smov [#allocation5]   ;;  %s18_s25 = sshll.u32 %s324_s0, 4  ;;  %s19_s25 = int_to_ptr.hbm [resolvable:$true] %s18_s25 }
   0x3   :  { %s30_s22 = sshll.u32 %s270_s21, 4  ;;  %s271_s26 = smov 128   ;;  %s31_s22 = int_to_ptr.vmem [resolvable:$true] %s30_s22 }
   0x4   :  { %s272_s27 = smov 8   ;;  %s273_s28 = smov [#allocation2]  }
   0x5   :  { %36 = dma.hbm_to_vmem [thread:$0]  %s29_s20, 512, %s31_s22, [#allocation6], %s271_s26, %s271_s26, %s272_s27  }
   0x6   :  { %s20_s29 = sshll.u32 %s273_s28, 4  ;;  %s43_s7 = sshll.u32 %s327_s3, 4  ;;  %s21_s29 = int_to_ptr.vmem [resolvable:$true] %s20_s29  ;;  %s44_s7 = int_to_ptr.hbm [resolvable:$true] %s43_s7 }
   0x7   :  { %23 = dma.hbm_to_vmem [thread:$0]  %s19_s25, 128, %s21_s29, [#allocation3]  }
   0x8   :  { %s274_s1 = smov [#allocation7]  }
   0x9   :  { %s45_s8 = sshll.u32 %s274_s1, 4  ;;  %s46_s8 = int_to_ptr.vmem [resolvable:$true] %s45_s8 }
   0xa   :  { %51 = dma.hbm_to_vmem [thread:$0]  %s44_s7, 2048, %s46_s8, [#allocation6], %s271_s26, %s271_s26, %s272_s27  }
   0xb   :  { %264 = dma.done.wait [#allocation3], 128  }
   0xc   :  { %265 = vsyncadd [#allocation3], 4294967168 }
   0xd   :  { %266 = dma.done.wait [#allocation6], 2560  }
   0xe   :  { %267 = vsyncadd [#allocation6], 4294964736  ;;  %v70_v0 = vld [vmem:[#allocation5 + $0x18] sm:$0xff]  ;;  %v69_v1 = vld [vmem:[#allocation5 + $0x10] sm:$0xff]  ;;  %vm75_vm0 = vcmask 261120   ;;  %s275_s11 = smov [#allocation8]  }
   0xf   :  { %91 = vmatpush.msra.mxu0 %v70_v0  ;;  %v115_v2 = vld [vmem:[#allocation7 + $0x78] sm:$0xff]  ;;  %v68_v3 = vld [vmem:[#allocation5 + $0x8] sm:$0xff]  ;;  %v114_v4 = vld [vmem:[#allocation7 + $0x70] sm:$0xff]  ;;  %s146_s12 = sshll.u32 %s275_s11, 4  ;;  %s148_s15 = sshll.u32 %s329_s5, 4  ;;  %s147_s12 = int_to_ptr.vmem [resolvable:$true] %s146_s12  ;;  %s149_s15 = int_to_ptr.hbm [resolvable:$true] %s148_s15 }
  0x10   :  { %120 = vmatpush.msra.mxu1 %v115_v2  ;;  %v113_v5 = vld [vmem:[#allocation7 + $0x68] sm:$0xff]  ;;  %v67_v6 = vld [vmem:[#allocation5] sm:$0xff]  ;;  %v66_v7 = vld [vmem:[#allocation2] sm:$0xff] }
  0x11   :  { %92 = vmatpush.msra.mxu0 %v69_v1  ;;  %v112_v8 = vld [vmem:[#allocation7 + $0x60] sm:$0xff]  ;;  %v111_v9 = vld [vmem:[#allocation7 + $0x58] sm:$0xff]  ;;  %v110_v10 = vld [vmem:[#allocation7 + $0x50] sm:$0xff] }
  0x12   :  { %121 = vmatpush.msra.mxu1 %v114_v4  ;;  %v109_v11 = vld [vmem:[#allocation7 + $0x48] sm:$0xff]  ;;  %v108_v12 = vld [vmem:[#allocation7 + $0x40] sm:$0xff]  ;;  %v107_v13 = vld [vmem:[#allocation7 + $0x38] sm:$0xff] }
  0x13   :  { %93 = vmatpush.msra.mxu0 %v68_v3  ;;  %v106_v14 = vld [vmem:[#allocation7 + $0x30] sm:$0xff]  ;;  %v105_v15 = vld [vmem:[#allocation7 + $0x28] sm:$0xff]  ;;  %v104_v16 = vld [vmem:[#allocation7 + $0x20] sm:$0xff] }
  0x14   :  { %122 = vmatpush.msra.mxu1 %v113_v5  ;;  %v103_v17 = vld [vmem:[#allocation7 + $0x18] sm:$0xff]  ;;  %v102_v18 = vld [vmem:[#allocation7 + $0x10] sm:$0xff]  ;;  %v101_v19 = vld [vmem:[#allocation7 + $0x8] sm:$0xff] }
  0x15   :  { %94 = vmatpush.msra.mxu0 %v67_v6  ;;  %v100_v20 = vld [vmem:[#allocation7] sm:$0xff]  ;;  %v166_v21 = vld [vmem:[%s326_s2] ss:$0 sm:$0xff] }
  0x16   :  { %159 = vmatmul.msk.f32.vlgmr.msra.gmra.mxu0 %vm75_vm0, %v66_v7  ;;  %123 = vmatpush.msra.mxu1 %v112_v8  ;;  %v167_v25 = vld [vmem:[%s328_s4] ss:$0 sm:$0xff] }
  0x18   :  { %124 = vmatpush.msra.mxu1 %v111_v9 }
  0x1a   :  { %125 = vmatpush.msra.mxu1 %v110_v10 }
  0x1c   :  { %126 = vmatpush.msra.mxu1 %v109_v11 }
  0x1e   :  { %127 = vmatpush.msra.mxu1 %v108_v12 }
  0x20   :  { %128 = vmatpush.msra.mxu1 %v107_v13 }
  0x22   :  { %129 = vmatpush.msra.mxu1 %v106_v14 }
  0x24   :  { %130 = vmatpush.msra.mxu1 %v105_v15 }
  0x26   :  { %131 = vmatpush.msra.mxu1 %v104_v16 }
  0x28   :  { %132 = vmatpush.msra.mxu1 %v103_v17 }
  0x2a   :  { %133 = vmatpush.msra.mxu1 %v102_v18 }
  0x2c   :  { %134 = vmatpush.msra.mxu1 %v101_v19 }
  0x2e   :  { %135 = vmatpush.msra.mxu1 %v100_v20 }
  0x93   :  { %v96_v22 = vpop.f32.mrf.mxu0 }
  0x94   :  { %v97_v23 = vadd.f32 %v166_v21, %v96_v22 }
  0x96   :  { %v99_v24 = vmax.f32 %v97_v23, 0.0 }
  0x98   :  { %136 = vmatmul.f32.vlgmr.msra.gmra.mxu1 %v99_v24 }
 0x115   :  { %v137_v26 = vpop.f32.mrf.mxu1 }
 0x116   :  { %v138_v27 = vadd.f32 %v167_v25, %v137_v26 }
 0x118   :  { %140 = vst [vmem:[#allocation8] sm:$0xff] %v138_v27 }
 0x119   :  { %151 = dma.vmem_to_hbm [thread:$0]  %s147_s12, 128, %s149_s15, [#allocation4]  }
 0x11a   :  { %268 = dma.done.wait [#allocation4], 128  }
 0x11b   :  { %269 = vsyncadd [#allocation4], 4294967168 }
 0x11c   :  { %156 = vsyncpa [#allocation3], 1 }
 0x11d   :  { %157 = vsyncpa [#allocation6], 1 }
 0x11e   :  { %158 = vsyncpa [#allocation4], 1 }

</bundles_post_ra>
